<compile_context>
chip_gen: v6e
topology: v6e:2x2x1
jax: 0.10.0
libtpu: 0.0.40
codegen_flags: <defaults>
</compile_context>

<pallas_src>
import jax
import jax.numpy as jnp
from jax.experimental import pallas as pl
from jax.experimental.pallas import tpu as pltpu


def _round_up(x, m):
    return (x + m - 1) // m * m


# ---------------------------------------------------------------------------
# Kernels
# ---------------------------------------------------------------------------

def _linear_small_kernel(x_ref, w_ref, b_ref, o_ref):
    """Whole problem resident in VMEM: single block, no grid."""
    o_ref[...] = (
        jnp.dot(x_ref[...], w_ref[...], preferred_element_type=jnp.float32)
        + b_ref[...]
    ).astype(o_ref.dtype)


def _linear_tiled_kernel_f32out(x_ref, w_ref, b_ref, o_ref):
    """Tiled path, f32 output: accumulate directly into the resident o_ref."""
    k = pl.program_id(2)

    @pl.when(k == 0)
    def _():
        o_ref[...] = jnp.zeros_like(o_ref)

    # weight is pre-transposed to (IN, OUT): plain lane-contracting MXU matmul.
    o_ref[...] += jnp.dot(x_ref[...], w_ref[...], preferred_element_type=jnp.float32)

    @pl.when(k == pl.num_programs(2) - 1)
    def _():
        o_ref[...] += b_ref[...]          # bias folded into the epilogue once


def _linear_tiled_kernel_acc(x_ref, w_ref, b_ref, o_ref, acc_ref):
    """Tiled path, low-precision output: f32 scratch accumulator."""
    k = pl.program_id(2)

    @pl.when(k == 0)
    def _():
        acc_ref[...] = jnp.zeros_like(acc_ref)

    acc_ref[...] += jnp.dot(x_ref[...], w_ref[...], preferred_element_type=jnp.float32)

    @pl.when(k == pl.num_programs(2) - 1)
    def _():
        o_ref[...] = (acc_ref[...] + b_ref[...]).astype(o_ref.dtype)


# ---------------------------------------------------------------------------
# Wrapper
# ---------------------------------------------------------------------------

def prepare_linear_params(weight, bias, *, compute_dtype=None):
    """One-time (init-time) layout transform of nn.Linear parameters.

    PyTorch (OUT, IN) weight -> (IN, OUT) so the hot path needs no transpose,
    bias -> (1, OUT) 2-D row for a lane-dense broadcast add (kept in f32).
    """
    w_t = jnp.asarray(weight).T
    if compute_dtype is not None:
        w_t = w_t.astype(compute_dtype)
    b2 = jnp.asarray(bias, dtype=jnp.float32).reshape(1, -1)
    return w_t, b2


def _pick_tm(bp8, cap):
    """Batch tile: whole (8-aligned) batch when it fits, else the multiple of 8
    <= cap that minimizes padding (avoids up-to-2x over-padded batches)."""
    if bp8 <= cap:
        return bp8
    best_tm, best_pad = cap, _round_up(bp8, cap) - bp8
    for tm in range(cap, 7, -8):
        pad = _round_up(bp8, tm) - bp8
        if pad < best_pad:
            best_tm, best_pad = tm, pad
        if pad == 0:
            break
    return best_tm


_FAST_PATH_BYTES = 4 * 1024 * 1024   # single-block path threshold


def linear_forward(x, w_t, b2, *, tm=None, tn=None, tk=None, compute_dtype=None):
    """y = x @ w_t + b2  (torch.nn.Linear forward; w_t is the pre-transposed weight)."""
    B, IN = x.shape
    IN_w, OUT = w_t.shape
    assert IN == IN_w, (IN, IN_w)
    assert b2.shape == (1, OUT), b2.shape

    out_dtype = x.dtype
    if compute_dtype is not None:
        x = x.astype(compute_dtype)
    itemsize = jnp.dtype(x.dtype).itemsize

    # ---- small-shape fast path: no padding, no grid, no output slice -------
    fast_bytes = (B * IN + IN * OUT + B * OUT) * itemsize + OUT * 4
    if tm is None and tn is None and tk is None and fast_bytes <= _FAST_PATH_BYTES:
        return pl.pallas_call(
            _linear_small_kernel,
            out_shape=jax.ShapeDtypeStruct((B, OUT), out_dtype),
        )(x, w_t, b2)

    # ---- tiled path ---------------------------------------------------------
    sub = 16 if itemsize == 2 else 8          # bf16 packs two rows per sublane
    bp8 = _round_up(B, sub)
    tm = tm or _pick_tm(bp8, 512)
    tn = tn or min(512, _round_up(OUT, 128))
    tk = tk or min(2048, _round_up(IN, 128))

    Bp = _round_up(bp8, tm)
    OUTp = _round_up(OUT, tn)
    INp = _round_up(IN, tk)

    # Megacore: if the batch axis has only one tile, split N so at least one
    # "parallel" grid axis has extent >= 2.
    if Bp // tm == 1 and OUTp // tn == 1 and tn >= 256:
        tn //= 2
        OUTp = _round_up(OUT, tn)

    # Zero-pad once so every tile is lane/sublane dense (zeros along K add
    # nothing; padded OUT columns and their zero bias are sliced off below).
    xp = x if (Bp == B and INp == IN) else jnp.pad(x, ((0, Bp - B), (0, INp - IN)))
    wp = w_t if (INp == IN and OUTp == OUT) else jnp.pad(
        w_t, ((0, INp - IN), (0, OUTp - OUT)))
    bpd = b2 if OUTp == OUT else jnp.pad(b2, ((0, 0), (0, OUTp - OUT)))

    grid = (Bp // tm, OUTp // tn, INp // tk)
    f32_out = out_dtype == jnp.float32
    kernel = _linear_tiled_kernel_f32out if f32_out else _linear_tiled_kernel_acc
    scratch = [] if f32_out else [pltpu.VMEM((tm, tn), jnp.float32)]

    yp = pl.pallas_call(
        kernel,
        out_shape=jax.ShapeDtypeStruct((Bp, OUTp), out_dtype),
        grid_spec=pltpu.PrefetchScalarGridSpec(
            num_scalar_prefetch=0,
            grid=grid,
            in_specs=[
                pl.BlockSpec((tm, tk), lambda i, j, k: (i, k)),   # x
                pl.BlockSpec((tk, tn), lambda i, j, k: (k, j)),   # weight (IN, OUT)
                pl.BlockSpec((1, tn), lambda i, j, k: (0, j)),    # bias
            ],
            out_specs=pl.BlockSpec((tm, tn), lambda i, j, k: (i, j)),
            scratch_shapes=scratch,
        ),
        compiler_params=pltpu.CompilerParams(
            dimension_semantics=("parallel", "parallel", "arbitrary"),
            # Worst-case double-buffered working set is ~18 MiB (tm=tn=512,
            # tk=2048, f32); 40 MiB is above v5e's 16 MiB / v6e-v7x 32 MiB
            # scoped defaults and below v7x's 64 MiB physical per-TC VMEM.
            vmem_limit_bytes=40 * 1024 * 1024,
        ),
    )(xp, wp, bpd)

    if Bp != B or OUTp != OUT:
        yp = yp[:B, :OUT]
    return yp


if __name__ == "__main__":
    # Module config: in_features_dim=32, out_features_dim=16
    in_features = 32
    out_features = 16
    batch = 8

    key = jax.random.PRNGKey(0)
    kx, kw, kb = jax.random.split(key, 3)

    x = jax.random.normal(kx, (batch, in_features), dtype=jnp.float32)
    # Deterministic params (mimic nn.Linear's uniform(-1/sqrt(in), 1/sqrt(in)))
    bound = 1.0 / (in_features ** 0.5)
    weight = jax.random.uniform(kw, (out_features, in_features),
                                minval=-bound, maxval=bound, dtype=jnp.float32)
    bias = jax.random.uniform(kb, (out_features,),
                              minval=-bound, maxval=bound, dtype=jnp.float32)

    # Init-time parameter layout transform (outside the hot path).
    w_t, b2 = prepare_linear_params(weight, bias)

    # --- shipped config: hits the no-pad single-block fast path -------------
    y = linear_forward(x, w_t, b2)
    jax.block_until_ready(y)
    y_ref = x @ weight.T + bias
    assert y.shape == (batch, out_features)
    assert jnp.allclose(y, y_ref, atol=1e-5, rtol=1e-5)

    # --- sanity-check the tiled path too (explicit tiles force it) ----------
    B2, IN2, OUT2 = 256, 256, 256
    k2x, k2w, k2b = jax.random.split(jax.random.PRNGKey(1), 3)
    x2 = jax.random.normal(k2x, (B2, IN2), dtype=jnp.float32)
    w2 = jax.random.normal(k2w, (OUT2, IN2), dtype=jnp.float32) * 0.05
    bb2 = jax.random.normal(k2b, (OUT2,), dtype=jnp.float32)
    w2_t, bb2_2d = prepare_linear_params(w2, bb2)
    y2 = linear_forward(x2, w2_t, bb2_2d, tm=256, tn=128, tk=256)
    jax.block_until_ready(y2)
    y2_ref = x2 @ w2.T + bb2
    assert jnp.allclose(y2, y2_ref, atol=1e-3, rtol=1e-3)

    print("KERNEL_OK")
</pallas_src>

<mosaic_0001>
module attributes {stable_mosaic.version = 11 : i64} {
  func.func @_linear_small_kernel(%arg0: memref<8x32xf32, #tpu.memory_space<vmem>>, %arg1: memref<32x16xf32, #tpu.memory_space<vmem>>, %arg2: memref<1x16xf32, #tpu.memory_space<vmem>>, %arg3: memref<8x16xf32, #tpu.memory_space<vmem>>) attributes {dimension_semantics = [], scalar_prefetch = 0 : i64, scratch_operands = 0 : i64, tpu.core_type = #tpu.core_type<tc>} {
    %c0 = arith.constant 0 : index
    %c0_0 = arith.constant 0 : index
    %0 = vector.load %arg0[%c0, %c0_0] : memref<8x32xf32, #tpu.memory_space<vmem>>, vector<8x32xf32>
    %c0_1 = arith.constant 0 : index
    %c0_2 = arith.constant 0 : index
    %1 = vector.load %arg1[%c0_1, %c0_2] : memref<32x16xf32, #tpu.memory_space<vmem>>, vector<32x16xf32>
    %cst = arith.constant dense<0.000000e+00> : vector<8x16xf32>
    %2 = tpu.matmul %0, %1, %cst {dimension_numbers = #tpu.dot_dimension_numbers<[1], [0], [0], [1], [0, 0, 1, 1], [], []>} : vector<8x32xf32>, vector<32x16xf32>, vector<8x16xf32> -> vector<8x16xf32>
    %c0_3 = arith.constant 0 : index
    %c0_4 = arith.constant 0 : index
    %3 = vector.load %arg2[%c0_3, %c0_4] : memref<1x16xf32, #tpu.memory_space<vmem>>, vector<1x16xf32>
    %4 = vector.broadcast %3 : vector<1x16xf32> to vector<8x16xf32>
    %5 = arith.addf %2, %4 : vector<8x16xf32>
    %c0_5 = arith.constant 0 : index
    %c0_6 = arith.constant 0 : index
    %6 = vector.load %arg3[%c0_5, %c0_6] : memref<8x16xf32, #tpu.memory_space<vmem>>, vector<8x16xf32>
    tpu.vector_store %arg3[%c0_5, %c0_6], %5 {strides = array<i32>} : memref<8x16xf32, #tpu.memory_space<vmem>>, vector<8x16xf32>,
    return
  }
}

</mosaic_0001>

<bundles_post_ra>
// kernel: tpu_custom_call.1
= control target key start
LH: loop header
LB: loop body
LE: loop exit
PB: predicated region body
PF: predicated region fallthrough
CT: control target
= control target key end

     0   :  { %v160_v1 = vmov 0.0   ;;  %vm161_vm0 = vmmov 0   ;;  %s204_s0 = inlined_call_operand.vmem [shape: f32[8,32], index: 0, kind: input, shape index: {}]   ;;  %s205_s1 = inlined_call_operand.vmem [shape: f32[32,16], index: 1, kind: input, shape index: {}]   ;;  %s206_s2 = inlined_call_operand.vmem [shape: f32[1,16], index: 2, kind: input, shape index: {}]   ;;  %s207_s3 = inlined_call_operand.hbm [shape: f32[8,16], index: 3, kind: output, shape index: {}]  }
   0x1   :  { %v19_v0 = vld [vmem:[%s205_s1 + $0x18] sm:$0xff]  ;;  %124 = vmatprep.subr.mxu0 %v160_v1  ;;  %v18_v2 = vld [vmem:[%s205_s1 + $0x10] sm:$0xff]  ;;  %132 = vmatprep.mubr.msk.f32.mxu0 %vm161_vm0, %v160_v1 }
   0x2   :  { %125 = vmatpush3.msra.mxu0 %v19_v0 }
   0x3   :  { %8 = vsyncpa [#allocation3], 0  ;;  %126 = vmatprep.subr.mxu0 %v160_v1  ;;  %v17_v3 = vld [vmem:[%s205_s1 + $0x8] sm:$0xff]  ;;  %v16_v4 = vld [vmem:[%s205_s1] sm:$0xff]  ;;  %vm27_vm1 = vcmask 261120   ;;  %s162_s24 = smov [#allocation2]  }
   0x4   :  { %127 = vmatpush3.msra.mxu0 %v18_v2  ;;  %v15_v5 = vld [vmem:[%s204_s0] sm:$0xff]  ;;  %s109_s25 = sshll.u32 %s162_s24, 4  ;;  %vm101_vm2 = vcmask 130048   ;;  %s110_s25 = int_to_ptr.vmem [resolvable:$true] %s109_s25 }
   0x5   :  { %128 = vmatprep.subr.mxu0 %v160_v1  ;;  %v117_v6 = vld [vmem:[%s206_s2] ss:$0 sm:$0xff]  ;;  %s138_s1 = scalar_lea.vmem %s110_s25, 128  ;;  %p143_p1 = scmp.lt.s32.totalorder %s110_s25, %s110_s25 }
   0x6   :  { %129 = vmatpush3.msra.mxu0 %v17_v3  ;;  %p139_p0 = scmp.ne.s32.totalorder %s110_s25, %s138_s1  ;;  %p144_p2 = scmp.lt.s32.totalorder %s138_s1, %s138_s1 }
   0x7   :  { %130 = vmatprep.subr.mxu0 %v160_v1 }
   0x8   :  { %131 = vmatpush3.msra.mxu0 %v16_v4  ;;  %p145_p3 = por %p144_p2, %p143_p1 }
   0x9   :  { %133 = vmatmul.mubr.msk.f32.vlgmr.msra.gmra.mxu0 %vm27_vm1, %v15_v5 }
   0xa   :  { %p146_p4 = pnand %p145_p3, %p139_p0 }
  0xc9   :  { %v97_v7 = vpop.f32.mrf.mxu0 }
  0xca   :  { %v98_v8 = vadd.f32 %v117_v6, %v97_v7 }
  0xcb   :  { %v134_v9 = vpop.f32.mrf.mxu0 }
  0xcc   :  { %102 = vst.msk [vmem:[#allocation2] sm:$0xff] %vm101_vm2, %v98_v8 }
  0xcd   :  { %149 = shalt.err (!%p146_p4)
}
  0xce   :  { %112 = dma.vmem_to_hbm [thread:$0]  %s110_s25, 128, %s207_s3, [#allocation3]  }
  0xcf   :  { %158 = dma.done.wait [#allocation3], 128  }
  0xd0   :  { %159 = vsyncadd [#allocation3], 4294967168 }
  0xd1   :  { %116 = vsyncpa [#allocation3], 1 }

</bundles_post_ra>
